<compile_context>
chip_gen: v5e
topology: v5e:2x2
jax: 0.10.0
libtpu: 0.0.40
codegen_flags: <defaults>
</compile_context>

<pallas_src>
import functools
import math

import jax
import jax.numpy as jnp
from jax.experimental import pallas as pl
from jax.experimental.pallas import tpu as pltpu


# ---------------------------------------------------------------------------
# Kernel
# ---------------------------------------------------------------------------
def _pg_kernel(x_ref, p_ref, out_ref, *, in_dim, hidden_dim, out_dim,
               w2_off, w3_off, vec_off):
    x = x_ref[...]                                      # (B, in_dim) f32

    # Static, sublane-aligned slices of the single parameter slab.
    w1 = p_ref[pl.ds(0, in_dim), :]                     # (in_dim, H)
    w2 = p_ref[pl.ds(w2_off, hidden_dim), :]            # (H, H)
    w3 = p_ref[pl.ds(w3_off, hidden_dim), :]            # (H, H), cols >= out_dim zero
    vec = p_ref[pl.ds(vec_off, 4), :]                   # rows: b1, gamma, beta, b3(padded)
    b1, gamma, beta, b3 = vec[0:1, :], vec[1:2, :], vec[2:3, :], vec[3:4, :]

    # ---- Linear(in_dim, H) + ReLU ----
    h = jnp.dot(x, w1, preferred_element_type=jnp.float32) + b1
    h = jnp.maximum(h, 0.0)

    # ---- Linear(H, H): bias omitted (cancels exactly under BatchNorm) ----
    h = jnp.dot(h, w2, preferred_element_type=jnp.float32)

    # ---- BatchNorm1d(H), training mode: one-pass batch stats + single FMA ----
    inv_n = 1.0 / h.shape[0]
    mean = jnp.sum(h, axis=0, keepdims=True) * inv_n
    ex2 = jnp.sum(h * h, axis=0, keepdims=True) * inv_n
    var = jnp.maximum(ex2 - mean * mean, 0.0)
    scale = gamma * jax.lax.rsqrt(var + 1e-5)
    shift = beta - mean * scale
    h = h * scale + shift

    # ---- ReLU ----
    h = jnp.maximum(h, 0.0)

    # ---- Linear(H, out_dim) done at padded width, then sliced ----
    logits = jnp.dot(h, w3, preferred_element_type=jnp.float32) + b3
    logits = logits[:, :out_dim]

    # ---- log_softmax(dim=1) (== Categorical(logits=...).logits) ----
    m = jnp.max(logits, axis=1, keepdims=True)
    shifted = logits - m
    lse = jnp.log(jnp.sum(jnp.exp(shifted), axis=1, keepdims=True))
    out_ref[...] = shifted - lse


# ---------------------------------------------------------------------------
# Wrapper
# ---------------------------------------------------------------------------
@functools.partial(
    jax.jit,
    static_argnames=("in_dim", "hidden_dim", "out_dim",
                     "w2_off", "w3_off", "vec_off"))
def pg_forward(x, param_slab, *, in_dim, hidden_dim, out_dim,
               w2_off, w3_off, vec_off):
    B = x.shape[0]
    kernel = functools.partial(
        _pg_kernel, in_dim=in_dim, hidden_dim=hidden_dim, out_dim=out_dim,
        w2_off=w2_off, w3_off=w3_off, vec_off=vec_off)
    # Everything fits trivially in VMEM: one call, no grid, full-array blocks.
    return pl.pallas_call(
        kernel,
        out_shape=jax.ShapeDtypeStruct((B, out_dim), jnp.float32),
        in_specs=[pl.BlockSpec(memory_space=pltpu.MemorySpace.VMEM),
                  pl.BlockSpec(memory_space=pltpu.MemorySpace.VMEM)],
        out_specs=pl.BlockSpec(memory_space=pltpu.MemorySpace.VMEM),
    )(x, param_slab)


def _round_up8(n):
    return -(-n // 8) * 8


def pack_params(w1, b1, w2, gamma, beta, w3, b3):
    """Pack all parameters into one padded f32 slab (columns = hidden_dim).

    Row layout (all section starts are multiples of 8):
      [0, in_dim)                : w1            (in_dim, H)
      [w2_off, w2_off+H)         : w2            (H, H)
      [w3_off, w3_off+H)         : w3 col-padded (H, H) (cols >= out_dim zero)
      [vec_off, vec_off+4)       : b1, gamma, beta, b3 (b3 col-padded)
    b2 is intentionally not packed: it cancels under BatchNorm.
    """
    in_dim, H = w1.shape
    out_dim = w3.shape[1]
    assert H >= out_dim, "packing assumes hidden_dim >= out_dim"

    in_pad, h_pad = _round_up8(in_dim), _round_up8(H)
    w2_off = in_pad
    w3_off = in_pad + h_pad
    vec_off = in_pad + 2 * h_pad
    total_rows = vec_off + 8

    slab = jnp.zeros((total_rows, H), jnp.float32)
    slab = slab.at[0:in_dim, :].set(w1)
    slab = slab.at[w2_off:w2_off + H, :].set(w2)
    slab = slab.at[w3_off:w3_off + H, 0:out_dim].set(w3)
    slab = slab.at[vec_off + 0, :].set(b1)
    slab = slab.at[vec_off + 1, :].set(gamma)
    slab = slab.at[vec_off + 2, :].set(beta)
    slab = slab.at[vec_off + 3, 0:out_dim].set(b3)

    static = dict(in_dim=in_dim, hidden_dim=H, out_dim=out_dim,
                  w2_off=w2_off, w3_off=w3_off, vec_off=vec_off)
    return slab, static


# ---------------------------------------------------------------------------
# Initialization + pure-JAX reference
# ---------------------------------------------------------------------------
def _xavier_uniform(key, fan_in, fan_out):
    # nn.init.xavier_uniform_: U(-a, a), a = sqrt(6 / (fan_in + fan_out)).
    # Stored as [in, out] (transpose of PyTorch's [out, in]); the bound is
    # symmetric in fan_in/fan_out so the distribution is identical.
    a = math.sqrt(6.0 / (fan_in + fan_out))
    return jax.random.uniform(key, (fan_in, fan_out), jnp.float32, -a, a)


def init_params(key, in_dim, out_dim, hidden_dim=64, *, nonzero_b2=False):
    k1, k2, k3, k4 = jax.random.split(key, 4)
    w1 = _xavier_uniform(k1, in_dim, hidden_dim)
    b1 = jnp.zeros((hidden_dim,), jnp.float32)
    w2 = _xavier_uniform(k2, hidden_dim, hidden_dim)
    # Fresh module has b2 = 0; we use a nonzero b2 in the test to prove the
    # kernel's "drop b2" optimization is exact (it cancels under BatchNorm).
    b2 = (jax.random.normal(k4, (hidden_dim,), jnp.float32)
          if nonzero_b2 else jnp.zeros((hidden_dim,), jnp.float32))
    gamma = jnp.ones((hidden_dim,), jnp.float32)    # BatchNorm1d weight
    beta = jnp.zeros((hidden_dim,), jnp.float32)    # BatchNorm1d bias
    w3 = _xavier_uniform(k3, hidden_dim, out_dim)
    b3 = jnp.zeros((out_dim,), jnp.float32)
    return (w1, b1, w2, b2, gamma, beta, w3, b3)


def reference_forward(x, params):
    """Pure-JAX reference mirroring the PyTorch module (training-mode BN)."""
    w1, b1, w2, b2, gamma, beta, w3, b3 = params
    h = jnp.maximum(x @ w1 + b1, 0.0)
    h = h @ w2 + b2
    mean = jnp.mean(h, axis=0, keepdims=True)
    var = jnp.mean((h - mean) ** 2, axis=0, keepdims=True)
    h = (h - mean) * jax.lax.rsqrt(var + 1e-5) * gamma + beta
    h = jnp.maximum(h, 0.0)
    logits = h @ w3 + b3
    return jax.nn.log_softmax(logits, axis=1)


# ---------------------------------------------------------------------------
# Demo / self-check
# ---------------------------------------------------------------------------
if __name__ == "__main__":
    in_dim, out_dim, hidden_dim = 16, 4, 128   # hidden=128 -> lane-dense vregs
    batch = 8                                  # BatchNorm1d needs batch > 1

    key = jax.random.PRNGKey(0)
    k_obs, k_params = jax.random.split(key)
    obs = jax.random.normal(k_obs, (batch, in_dim), jnp.float32)
    params = init_params(k_params, in_dim, out_dim, hidden_dim, nonzero_b2=True)
    w1, b1, w2, b2, gamma, beta, w3, b3 = params

    slab, static = pack_params(w1, b1, w2, gamma, beta, w3, b3)

    log_probs = pg_forward(obs, slab, **static)
    log_probs = jax.block_until_ready(log_probs)

    ref = reference_forward(obs, params)
    assert log_probs.shape == (batch, out_dim)
    assert jnp.allclose(log_probs, ref, atol=1e-4, rtol=1e-4), (
        float(jnp.max(jnp.abs(log_probs - ref))))
    # log-probs rows should sum to 1 in probability space
    assert jnp.allclose(jnp.sum(jnp.exp(log_probs), axis=1), 1.0, atol=1e-5)

    print("KERNEL_OK")
</pallas_src>

<mosaic_0001>
module attributes {stable_mosaic.version = 11 : i64} {
  func.func @_pg_kernel(%arg0: memref<8x16xf32, #tpu.memory_space<vmem>>, %arg1: memref<280x128xf32, #tpu.memory_space<vmem>>, %arg2: memref<8x4xf32, #tpu.memory_space<vmem>>) attributes {dimension_semantics = [], scalar_prefetch = 0 : i64, scratch_operands = 0 : i64, tpu.core_type = #tpu.core_type<tc>} {
    %c0 = arith.constant 0 : index
    %c0_0 = arith.constant 0 : index
    %0 = vector.load %arg0[%c0, %c0_0] : memref<8x16xf32, #tpu.memory_space<vmem>>, vector<8x16xf32>
    %c0_1 = arith.constant 0 : index
    %c0_2 = arith.constant 0 : index
    %1 = vector.load %arg1[%c0_1, %c0_2] : memref<280x128xf32, #tpu.memory_space<vmem>>, vector<16x128xf32>
    %c16 = arith.constant 16 : index
    %c0_3 = arith.constant 0 : index
    %2 = vector.load %arg1[%c16, %c0_3] : memref<280x128xf32, #tpu.memory_space<vmem>>, vector<128x128xf32>
    %c144 = arith.constant 144 : index
    %c0_4 = arith.constant 0 : index
    %3 = vector.load %arg1[%c144, %c0_4] : memref<280x128xf32, #tpu.memory_space<vmem>>, vector<128x128xf32>
    %c272 = arith.constant 272 : index
    %c0_5 = arith.constant 0 : index
    %4 = vector.load %arg1[%c272, %c0_5] : memref<280x128xf32, #tpu.memory_space<vmem>>, vector<4x128xf32>
    %5 = vector.extract_strided_slice %4 {offsets = [0, 0], sizes = [1, 128], strides = [1, 1]} : vector<4x128xf32> to vector<1x128xf32>
    %6 = vector.extract_strided_slice %4 {offsets = [1, 0], sizes = [1, 128], strides = [1, 1]} : vector<4x128xf32> to vector<1x128xf32>
    %7 = vector.extract_strided_slice %4 {offsets = [2, 0], sizes = [1, 128], strides = [1, 1]} : vector<4x128xf32> to vector<1x128xf32>
    %8 = vector.extract_strided_slice %4 {offsets = [3, 0], sizes = [1, 128], strides = [1, 1]} : vector<4x128xf32> to vector<1x128xf32>
    %cst = arith.constant dense<0.000000e+00> : vector<8x128xf32>
    %9 = tpu.matmul %0, %1, %cst {dimension_numbers = #tpu.dot_dimension_numbers<[1], [0], [0], [1], [0, 0, 1, 1], [], []>} : vector<8x16xf32>, vector<16x128xf32>, vector<8x128xf32> -> vector<8x128xf32>
    %10 = vector.broadcast %5 : vector<1x128xf32> to vector<8x128xf32>
    %11 = arith.addf %9, %10 : vector<8x128xf32>
    %cst_6 = arith.constant 0.000000e+00 : f32
    %12 = vector.broadcast %cst_6 : f32 to vector<8x128xf32>
    %13 = arith.maximumf %11, %12 : vector<8x128xf32>
    %cst_7 = arith.constant dense<0.000000e+00> : vector<8x128xf32>
    %14 = tpu.matmul %13, %2, %cst_7 {dimension_numbers = #tpu.dot_dimension_numbers<[1], [0], [0], [1], [0, 0, 1, 1], [], []>} : vector<8x128xf32>, vector<128x128xf32>, vector<8x128xf32> -> vector<8x128xf32>
    %cst_8 = arith.constant dense<0.000000e+00> : vector<128xf32>
    %15 = vector.multi_reduction <add>, %14, %cst_8 [0] : vector<8x128xf32> to vector<128xf32>
    %16 = vector.shape_cast %15 : vector<128xf32> to vector<1x128xf32>
    %cst_9 = arith.constant 1.250000e-01 : f32
    %17 = vector.broadcast %cst_9 : f32 to vector<1x128xf32>
    %18 = arith.mulf %16, %17 : vector<1x128xf32>
    %19 = arith.mulf %14, %14 : vector<8x128xf32>
    %cst_10 = arith.constant dense<0.000000e+00> : vector<128xf32>
    %20 = vector.multi_reduction <add>, %19, %cst_10 [0] : vector<8x128xf32> to vector<128xf32>
    %21 = vector.shape_cast %20 : vector<128xf32> to vector<1x128xf32>
    %cst_11 = arith.constant 1.250000e-01 : f32
    %22 = vector.broadcast %cst_11 : f32 to vector<1x128xf32>
    %23 = arith.mulf %21, %22 : vector<1x128xf32>
    %24 = arith.mulf %18, %18 : vector<1x128xf32>
    %25 = arith.subf %23, %24 : vector<1x128xf32>
    %cst_12 = arith.constant 0.000000e+00 : f32
    %26 = vector.broadcast %cst_12 : f32 to vector<1x128xf32>
    %27 = arith.maximumf %25, %26 : vector<1x128xf32>
    %cst_13 = arith.constant 9.99999974E-6 : f32
    %28 = vector.broadcast %cst_13 : f32 to vector<1x128xf32>
    %29 = arith.addf %27, %28 : vector<1x128xf32>
    %30 = math.rsqrt %29 : vector<1x128xf32>
    %31 = arith.mulf %6, %30 : vector<1x128xf32>
    %32 = arith.mulf %18, %31 : vector<1x128xf32>
    %33 = arith.subf %7, %32 : vector<1x128xf32>
    %34 = vector.broadcast %31 : vector<1x128xf32> to vector<8x128xf32>
    %35 = arith.mulf %14, %34 : vector<8x128xf32>
    %36 = vector.broadcast %33 : vector<1x128xf32> to vector<8x128xf32>
    %37 = arith.addf %35, %36 : vector<8x128xf32>
    %cst_14 = arith.constant 0.000000e+00 : f32
    %38 = vector.broadcast %cst_14 : f32 to vector<8x128xf32>
    %39 = arith.maximumf %37, %38 : vector<8x128xf32>
    %cst_15 = arith.constant dense<0.000000e+00> : vector<8x128xf32>
    %40 = tpu.matmul %39, %3, %cst_15 {dimension_numbers = #tpu.dot_dimension_numbers<[1], [0], [0], [1], [0, 0, 1, 1], [], []>} : vector<8x128xf32>, vector<128x128xf32>, vector<8x128xf32> -> vector<8x128xf32>
    %41 = vector.broadcast %8 : vector<1x128xf32> to vector<8x128xf32>
    %42 = arith.addf %40, %41 : vector<8x128xf32>
    %43 = vector.extract_strided_slice %42 {offsets = [0, 0], sizes = [8, 4], strides = [1, 1]} : vector<8x128xf32> to vector<8x4xf32>
    %cst_16 = arith.constant dense<0xFF800000> : vector<8xf32>
    %44 = vector.multi_reduction <maximumf>, %43, %cst_16 [1] : vector<8x4xf32> to vector<8xf32>
    %45 = vector.shape_cast %44 : vector<8xf32> to vector<8x1xf32>
    %46 = vector.broadcast %45 : vector<8x1xf32> to vector<8x4xf32>
    %47 = arith.subf %43, %46 : vector<8x4xf32>
    %48 = math.exp %47 : vector<8x4xf32>
    %cst_17 = arith.constant dense<0.000000e+00> : vector<8xf32>
    %49 = vector.multi_reduction <add>, %48, %cst_17 [1] : vector<8x4xf32> to vector<8xf32>
    %50 = vector.shape_cast %49 : vector<8xf32> to vector<8x1xf32>
    %51 = math.log %50 : vector<8x1xf32>
    %52 = vector.broadcast %51 : vector<8x1xf32> to vector<8x4xf32>
    %53 = arith.subf %47, %52 : vector<8x4xf32>
    %c0_18 = arith.constant 0 : index
    %c0_19 = arith.constant 0 : index
    %54 = vector.load %arg2[%c0_18, %c0_19] : memref<8x4xf32, #tpu.memory_space<vmem>>, vector<8x4xf32>
    tpu.vector_store %arg2[%c0_18, %c0_19], %53 {strides = array<i32>} : memref<8x4xf32, #tpu.memory_space<vmem>>, vector<8x4xf32>,
    return
  }
}

</mosaic_0001>

<bundles_post_ra>
// kernel: pg_forward.1
= control target key start
LH: loop header
LB: loop body
LE: loop exit
PB: predicated region body
PF: predicated region fallthrough
CT: control target
= control target key end

     0   :  { %7 = vsyncpa [#allocation3], 0  ;;  %s304_s0 = inlined_call_operand.hbm [shape: f32[8,16], index: 0, kind: input, shape index: {}]   ;;  %s305_s1 = inlined_call_operand.hbm [shape: f32[280,128], index: 1, kind: input, shape index: {}]   ;;  %s306_s2 = inlined_call_operand.vmem [shape: f32[8,4], index: 2, kind: output, shape index: {}]  }
   0x1   :  { %s14_s11 = sshll.u32 %s304_s0, 4  ;;  %s15_s11 = int_to_ptr.hbm [resolvable:$true] %s14_s11 }
   0x2   :  { %8 = vsyncpa [#allocation5], 0  ;;  %s267_s12 = smov [#allocation2]   ;;  %s24_s16 = sshll.u32 %s305_s1, 4  ;;  %s25_s16 = int_to_ptr.hbm [resolvable:$true] %s24_s16 }
   0x3   :  { %s16_s13 = sshll.u32 %s267_s12, 4  ;;  %s268_s17 = smov [#allocation4]   ;;  %s17_s13 = int_to_ptr.vmem [resolvable:$true] %s16_s13 }
   0x4   :  { %19 = dma.hbm_to_vmem [thread:$0]  %s15_s11, 128, %s17_s13, [#allocation3]  }
   0x5   :  { %s26_s18 = sshll.u32 %s268_s17, 4  ;;  %s269_s19 = smov 128   ;;  %s27_s18 = int_to_ptr.vmem [resolvable:$true] %s26_s18 }
   0x6   :  { %s270_s20 = smov 8  }
   0x7   :  { %32 = dma.hbm_to_vmem [thread:$0]  %s25_s16, 4480, %s27_s18, [#allocation5], %s269_s19, %s269_s19, %s270_s20  }
   0x8   :  { %263 = dma.done.wait [#allocation3], 128  }
   0x9   :  { %264 = vsyncadd [#allocation3], 4294967168 }
   0xa   :  { %265 = dma.done.wait [#allocation5], 4480  }
   0xb   :  { %266 = vsyncadd [#allocation5], 4294962816  ;;  %v43_v0 = vld [vmem:[#allocation4 + $0x8] sm:$0xff]  ;;  %v42_v1 = vld [vmem:[#allocation4] sm:$0xff]  ;;  %vm78_vm0 = vcmask 130048   ;;  %vm184_vm4 = vcmask 31744  }
   0xc   :  { %96 = vmatpush.msra.mxu0 %v43_v0  ;;  %v41_v2 = vld [vmem:[#allocation2] sm:$0xff]  ;;  %v59_v3 = vld [vmem:[#allocation4 + $0x88] sm:$0xff]  ;;  %v58_v4 = vld [vmem:[#allocation4 + $0x80] sm:$0xff] }
   0xd   :  { %103 = vmatpush.msra.mxu1 %v59_v3  ;;  %v57_v5 = vld [vmem:[#allocation4 + $0x78] sm:$0xff]  ;;  %v56_v6 = vld [vmem:[#allocation4 + $0x70] sm:$0xff]  ;;  %v55_v7 = vld [vmem:[#allocation4 + $0x68] sm:$0xff] }
   0xe   :  { %97 = vmatpush.msra.mxu0 %v42_v1  ;;  %v54_v8 = vld [vmem:[#allocation4 + $0x60] sm:$0xff]  ;;  %v53_v9 = vld [vmem:[#allocation4 + $0x58] sm:$0xff]  ;;  %v52_v10 = vld [vmem:[#allocation4 + $0x50] sm:$0xff] }
   0xf   :  { %204 = vmatmul.msk.f32.vlgmr.msra.gmra.mxu0 %vm78_vm0, %v41_v2  ;;  %104 = vmatpush.msra.mxu1 %v58_v4  ;;  %v51_v11 = vld [vmem:[#allocation4 + $0x48] sm:$0xff]  ;;  %v50_v12 = vld [vmem:[#allocation4 + $0x40] sm:$0xff]  ;;  %v49_v13 = vld [vmem:[#allocation4 + $0x38] sm:$0xff] }
  0x10   :  { %v48_v14 = vld [vmem:[#allocation4 + $0x30] sm:$0xff]  ;;  %v47_v15 = vld [vmem:[#allocation4 + $0x28] sm:$0xff]  ;;  %v46_v16 = vld [vmem:[#allocation4 + $0x20] sm:$0xff] }
  0x11   :  { %105 = vmatpush.msra.mxu1 %v57_v5  ;;  %v45_v17 = vld [vmem:[#allocation4 + $0x18] sm:$0xff]  ;;  %v44_v18 = vld [vmem:[#allocation4 + $0x10] sm:$0xff]  ;;  %v75_v24 = vld [vmem:[#allocation4 + $0x108] sm:$0xff] }
  0x12   :  { %v292_v19 = vld [vmem:[#allocation4 + $0x110] sm:$0xf]  ;;  %164 = vmatpush.msra.mxu2 %v75_v24  ;;  %v74_v25 = vld [vmem:[#allocation4 + $0x100] sm:$0xff]  ;;  %v73_v26 = vld [vmem:[#allocation4 + $0xf8] sm:$0xff] }
  0x13   :  { %106 = vmatpush.msra.mxu1 %v56_v6  ;;  %v77_v20 = vperm.slane %v292_v19, 0  ;;  %v72_v27 = vld [vmem:[#allocation4 + $0xf0] sm:$0xff]  ;;  %v71_v28 = vld [vmem:[#allocation4 + $0xe8] sm:$0xff]  ;;  %v70_v32 = vld [vmem:[#allocation4 + $0xe0] sm:$0xff] }
  0x14   :  { %165 = vmatpush.msra.mxu2 %v74_v25  ;;  %v69_v35 = vld [vmem:[#allocation4 + $0xd8] sm:$0xff]  ;;  %v68_v38 = vld [vmem:[#allocation4 + $0xd0] sm:$0xff]  ;;  %v67_v41 = vld [vmem:[#allocation4 + $0xc8] sm:$0xff] }
  0x15   :  { %107 = vmatpush.msra.mxu1 %v55_v7  ;;  %v66_v44 = vld [vmem:[#allocation4 + $0xc0] sm:$0xff]  ;;  %v65_v47 = vld [vmem:[#allocation4 + $0xb8] sm:$0xff]  ;;  %v64_v50 = vld [vmem:[#allocation4 + $0xb0] sm:$0xff] }
  0x16   :  { %166 = vmatpush.msra.mxu2 %v73_v26  ;;  %v63_v51 = vld [vmem:[#allocation4 + $0xa8] sm:$0xff]  ;;  %v62_v54 = vld [vmem:[#allocation4 + $0xa0] sm:$0xff]  ;;  %v61_v56 = vld [vmem:[#allocation4 + $0x98] sm:$0xff] }
  0x17   :  { %108 = vmatpush.msra.mxu1 %v54_v8  ;;  %v60_v58 = vld [vmem:[#allocation4 + $0x90] sm:$0xff] }
  0x18   :  { %167 = vmatpush.msra.mxu2 %v72_v27 }
  0x19   :  { %109 = vmatpush.msra.mxu1 %v53_v9 }
  0x1a   :  { %168 = vmatpush.msra.mxu2 %v71_v28 }
  0x1b   :  { %110 = vmatpush.msra.mxu1 %v52_v10 }
  0x1c   :  { %169 = vmatpush.msra.mxu2 %v70_v32 }
  0x1d   :  { %111 = vmatpush.msra.mxu1 %v51_v11 }
  0x1e   :  { %170 = vmatpush.msra.mxu2 %v69_v35 }
  0x1f   :  { %112 = vmatpush.msra.mxu1 %v50_v12  ;;  %v163_v12 = vperm.slane %v292_v19, 3 }
  0x20   :  { %171 = vmatpush.msra.mxu2 %v68_v38 }
  0x21   :  { %113 = vmatpush.msra.mxu1 %v49_v13 }
  0x22   :  { %172 = vmatpush.msra.mxu2 %v67_v41 }
  0x23   :  { %114 = vmatpush.msra.mxu1 %v48_v14 }
  0x24   :  { %173 = vmatpush.msra.mxu2 %v66_v44 }
  0x25   :  { %115 = vmatpush.msra.mxu1 %v47_v15 }
  0x26   :  { %174 = vmatpush.msra.mxu2 %v65_v47 }
  0x27   :  { %116 = vmatpush.msra.mxu1 %v46_v16 }
  0x28   :  { %175 = vmatpush.msra.mxu2 %v64_v50 }
  0x29   :  { %117 = vmatpush.msra.mxu1 %v45_v17 }
  0x2a   :  { %176 = vmatpush.msra.mxu2 %v63_v51 }
  0x2b   :  { %118 = vmatpush.msra.mxu1 %v44_v18 }
  0x2c   :  { %177 = vmatpush.msra.mxu2 %v62_v54 }
  0x2e   :  { %178 = vmatpush.msra.mxu2 %v61_v56 }
  0x30   :  { %179 = vmatpush.msra.mxu2 %v60_v58 }
  0x8c   :  { %v99_v21 = vpop.f32.mrf.mxu0 }
  0x8d   :  { %v100_v22 = vadd.f32 %v99_v21, %v77_v20 }
  0x8f   :  { %v102_v23 = vmax.f32 %v100_v22, 0.0 }
  0x91   :  { %119 = vmatmul.f32.vlgmr.msra.gmra.mxu1 %v102_v23 }
 0x10e   :  { %v120_v29 = vpop.f32.mrf.mxu1 }
 0x10f   :  { %v123_v30 = vrot.slane %v120_v29, 4  ;;  %v130_v31 = vmul.f32 %v120_v29, %v120_v29 }
 0x111   :  { %v124_v33 = vadd.f32 %v123_v30, %v120_v29  ;;  %v131_v34 = vrot.slane %v130_v31, 4 }
 0x113   :  { %v125_v36 = vrot.slane %v124_v33, 2  ;;  %v132_v37 = vadd.f32 %v131_v34, %v130_v31 }
 0x115   :  { %v126_v39 = vadd.f32 %v125_v36, %v124_v33  ;;  %v133_v40 = vrot.slane %v132_v37, 2 }
 0x117   :  { %v127_v42 = vrot.slane %v126_v39, 1  ;;  %v134_v43 = vadd.f32 %v133_v40, %v132_v37 }
 0x119   :  { %v128_v45 = vadd.f32 %v127_v42, %v126_v39  ;;  %v135_v46 = vrot.slane %v134_v43, 1 }
 0x11b   :  { %v129_v48 = vmul.f32 0.125, %v128_v45  ;;  %v136_v49 = vadd.f32 %v135_v46, %v134_v43 }
 0x11d   :  { %v137_v52 = vmul.f32 0.125, %v136_v49  ;;  %v138_v53 = vmul.f32 %v129_v48, %v129_v48 }
 0x11f   :  { %v139_v55 = vsub.f32 %v137_v52, %v138_v53 }
 0x121   :  { %v140_v57 = vmax.f32 %v139_v55, 0.0 }
 0x123   :  { %v141_v59 = vadd.f32 1e-05, %v140_v57 }
 0x125   :  { %209 = vrsqrt.f32 %v141_v59  ;;  %vm148_vm2 = vweird.f32 %v141_v59 }
 0x12b   :  { %v210_v60 = vpop.eup %209 }
 0x12c   :  { %v143_v61 = vmul.f32 %v210_v60, %v141_v59  ;;  %vm149_vm1 = vweird.f32 %v210_v60 }
 0x12d   :  { %vm150_vm3 = vmor %vm148_vm2, %vm149_vm1 }
 0x12e   :  { %v144_v62 = vmul.f32 %v210_v60, %v143_v61 }
 0x130   :  { %v145_v63 = vmul.f32 0.5, %v144_v62 }
 0x132   :  { %v146_v0 = vsub.f32 1.5, %v145_v63 }
 0x134   :  { %v147_v1 = vmul.f32 %v210_v60, %v146_v0 }
 0x136   :  { %v151_v2 = vsel %vm150_vm3, %v210_v60, %v147_v1 }
 0x137   :  { %v152_v3 = vmul.f32 %v151_v2, %v292_v19 }
 0x139   :  { %v153_v4 = vmul.f32 %v152_v3, %v129_v48  ;;  %v158_v5 = vperm.slane %v152_v3, 1 }
 0x13b   :  { %v155_v6 = vrot.slane %v153_v4, 7  ;;  %v159_v8 = vmul.f32 %v158_v5, %v120_v29 }
 0x13d   :  { %v157_v7 = vsub.f32 %v292_v19, %v155_v6 }
 0x13f   :  { %v160_v9 = vperm.slane %v157_v7, 2 }
 0x141   :  { %v161_v10 = vadd.f32 %v160_v9, %v159_v8 }
 0x143   :  { %v162_v11 = vmax.f32 %v161_v10, 0.0 }
 0x145   :  { %180 = vmatmul.f32.vlgmr.msra.gmra.mxu2 %v162_v11 }
 0x1c8   :  { %v181_v13 = vpop.f32.mrf.mxu2 }
 0x1c9   :  { %v182_v14 = vadd.f32 %v181_v13, %v163_v12 }
 0x1cb   :  { %v185_v15 = vsel %vm184_vm4, %v182_v14, -inf }
 0x1cc   :  { %186 = vmax.xlane.f32.xlu0 %v185_v15 }
 0x23f   :  { %v187_v16 = vpop.xlane.xlu0 %186 }
 0x240   :  { %v188_v17 = vsub.f32 %v182_v14, %v187_v16 }
 0x242   :  { %v189_v18 = vmul.f32 1.442695, %v188_v17 }
 0x244   :  { %211 = vpow2.f32 %v189_v18 }
 0x24a   :  { %v212_v20 = vpop.eup %211 }
 0x24b   :  { %v191_v21 = vsel %vm184_vm4, %v212_v20, 0.0 }
 0x24c   :  { %192 = vadd.xlane.f32.xlu0 %v191_v21 }
 0x2bf   :  { %v193_v22 = vpop.xlane.xlu0 %192 }
 0x2c0   :  { %213 = vlog2.f32 %v193_v22 }
 0x2c6   :  { %v214_v23 = vpop.eup %213 }
 0x2c7   :  { %v195_v24 = vmul.f32 0.6931472, %v214_v23 }
 0x2c9   :  { %v196_v25 = vsub.f32 %v188_v17, %v195_v24 }
 0x2cb   :  { %197 = vst.msk [vmem:[%s306_s2] sm:$0xff] %vm184_vm4, %v196_v25 }
 0x2cc   :  { %202 = vsyncpa [#allocation3], 1 }
 0x2cd   :  { %203 = vsyncpa [#allocation5], 1 }

</bundles_post_ra>
